<compile_context>
chip_gen: v7x
topology: tpu7x:2x2x1
jax: 0.10.0
libtpu: 0.0.40
codegen_flags: <defaults>
</compile_context>

<pallas_src>
import functools
import math

import jax
import jax.numpy as jnp
from jax import lax
from jax.experimental import pallas as pl
from jax.experimental.pallas import tpu as pltpu

# -------- small synthetic BERT config --------
VOCAB = 64
MAX_POS = 16
TYPE_VOCAB = 2
HIDDEN = 32
NUM_HEADS = 4
HEAD_DIM = HIDDEN // NUM_HEADS
INTERMEDIATE = 4 * HIDDEN
NUM_LAYERS = 2
NUM_LABELS = 4
LN_EPS = 1e-12

_SQRT_HALF = 0.7071067811865476

# bf16 for MXU inputs / inter-block activations; f32 for all statistics.
ACT_DTYPE = jnp.bfloat16


def _row_tile(m):
    # Biggest row tile that fits; cap at 256 rows for real sizes so the resident
    # FFN weights + activation tiles stay within scoped VMEM.
    tm = m if m <= 256 else 256
    assert m % tm == 0, "row count must tile evenly"
    return tm


def _layernorm(h, g, b):
    # f32 statistics (eps=1e-12 matches HF BERT; would underflow in bf16).
    mean = jnp.mean(h, axis=-1, keepdims=True)
    var = jnp.mean(jnp.square(h - mean), axis=-1, keepdims=True)
    inv = lax.rsqrt(var + LN_EPS)
    return (h - mean) * inv * g + b


# ============================ Pallas kernels ============================

def _emb_ln_kernel(we_ref, pe_ref, te_ref, g_ref, b_ref, o_ref):
    """Fused embedding sum + LayerNorm: LN(word + pos + type).  Avoids
    materializing the summed embeddings in HBM (pure mem-bound workload)."""
    h = we_ref[0] + pe_ref[...] + te_ref[...]          # (S, H) f32
    o_ref[0] = _layernorm(h, g_ref[...], b_ref[...]).astype(o_ref.dtype)


def embed_layernorm(we, pe, te, gamma, beta, *, batch, seq):
    H = HIDDEN
    return pl.pallas_call(
        _emb_ln_kernel,
        out_shape=jax.ShapeDtypeStruct((batch, seq, H), ACT_DTYPE),
        grid=(batch,),
        in_specs=[
            pl.BlockSpec((1, seq, H), lambda b: (b, 0, 0)),   # gathered word emb
            pl.BlockSpec((seq, H), lambda b: (0, 0)),         # position emb
            pl.BlockSpec((1, H), lambda b: (0, 0)),           # type emb (ids == 0)
            pl.BlockSpec((1, H), lambda b: (0, 0)),           # ln gamma
            pl.BlockSpec((1, H), lambda b: (0, 0)),           # ln beta
        ],
        out_specs=pl.BlockSpec((1, seq, H), lambda b: (b, 0, 0)),
        compiler_params=pltpu.CompilerParams(dimension_semantics=("parallel",)),
    )(we, pe, te, gamma.reshape(1, H), beta.reshape(1, H))


def _attn_block_kernel(x_ref, wqkv_ref, bqkv_ref, wo_ref, bo_ref, g_ref, b_ref,
                       o_ref, *, num_heads, head_dim):
    """Fused self-attention block for one batch element (all heads):
       LayerNorm(x + MultiHeadSelfAttention(x) @ Wo + bo).

    - One lane-dense (S,H)@(H,3H) MXU dot produces Q|K|V for all heads.
    - 1/sqrt(head_dim) is pre-folded into the Q weight/bias columns at init.
    - Per-head contexts are lane-concatenated and hit the MXU once with K=H
      for the output projection (no accumulating K=head_dim dots)."""
    H = num_heads * head_dim
    x = x_ref[0]                                                    # (S, H) bf16
    qkv = jnp.dot(x, wqkv_ref[...], preferred_element_type=jnp.float32)
    qkv = qkv + bqkv_ref[...]                                       # (S, 3H) f32

    ctx_heads = []
    # TODO(synk): for real head counts use lax.fori_loop / batch >=4 heads per
    # MXU call so vreg live ranges stay bounded and the 256-wide MXU is filled.
    for h in range(num_heads):
        q = qkv[:, h * head_dim:(h + 1) * head_dim].astype(ACT_DTYPE)
        k = qkv[:, H + h * head_dim:H + (h + 1) * head_dim].astype(ACT_DTYPE)
        v = qkv[:, 2 * H + h * head_dim:2 * H + (h + 1) * head_dim].astype(ACT_DTYPE)
        s = jnp.einsum("qd,kd->qk", q, k,
                       preferred_element_type=jnp.float32)          # (S, S) f32
        m = jnp.max(s, axis=-1, keepdims=True)
        p = jnp.exp(s - m)
        p = p * pl.reciprocal(jnp.sum(p, axis=-1, keepdims=True), approx=True)
        ctx_heads.append(jnp.dot(p.astype(ACT_DTYPE), v,
                                 preferred_element_type=jnp.float32))
    ctx = jnp.concatenate(ctx_heads, axis=-1).astype(ACT_DTYPE)     # (S, H) bf16
    attn = jnp.dot(ctx, wo_ref[...], preferred_element_type=jnp.float32)
    attn = attn + bo_ref[...]
    # residual add + LayerNorm fused in the epilogue (no extra HBM round trip)
    o_ref[0] = _layernorm(attn + x.astype(jnp.float32),
                          g_ref[...], b_ref[...]).astype(o_ref.dtype)


def attention_block(x, lp, *, batch, seq):
    """x: (B*S, H) bf16 -> LayerNorm(x + MultiHeadSelfAttention(x)); one call."""
    H = HIDDEN
    x3 = x.reshape(batch, seq, H)                 # free (contiguous) reshape
    kernel = functools.partial(_attn_block_kernel, num_heads=NUM_HEADS,
                               head_dim=HEAD_DIM)
    # TODO(synk): no attention_mask is applied (the wrapper never passes one /
    # HF defaults to all-ones); padded batches would need an additive mask here.
    out = pl.pallas_call(
        kernel,
        out_shape=jax.ShapeDtypeStruct((batch, seq, H), ACT_DTYPE),
        grid=(batch,),
        in_specs=[
            pl.BlockSpec((1, seq, H), lambda b: (b, 0, 0)),
            pl.BlockSpec((H, 3 * H), lambda b: (0, 0)),   # fused QKV weight (bf16)
            pl.BlockSpec((1, 3 * H), lambda b: (0, 0)),   # fused QKV bias (f32)
            pl.BlockSpec((H, H), lambda b: (0, 0)),       # Wo (bf16)
            pl.BlockSpec((1, H), lambda b: (0, 0)),       # bo
            pl.BlockSpec((1, H), lambda b: (0, 0)),       # ln gamma
            pl.BlockSpec((1, H), lambda b: (0, 0)),       # ln beta
        ],
        out_specs=pl.BlockSpec((1, seq, H), lambda b: (b, 0, 0)),
        compiler_params=pltpu.CompilerParams(dimension_semantics=("parallel",)),
    )(x3, lp["wqkv"], lp["bqkv"], lp["wo"], lp["bo"],
      lp["ln1_g"].reshape(1, H), lp["ln1_b"].reshape(1, H))
    return out.reshape(batch * seq, H)


def _ffn_block_kernel(x_ref, wi_ref, bi_ref, wf_ref, bf_ref, g_ref, b_ref, o_ref):
    """Fused FFN block: LayerNorm(x + GELU(x @ Wi + bi) @ Wf + bf)."""
    x = x_ref[...]                                                  # (tm, H) bf16
    h = jnp.dot(x, wi_ref[...], preferred_element_type=jnp.float32) + bi_ref[...]
    h = 0.5 * h * (1.0 + lax.erf(h * _SQRT_HALF))   # exact (erf) GELU, f32 VPU/EUP
    y = jnp.dot(h.astype(ACT_DTYPE), wf_ref[...],
                preferred_element_type=jnp.float32) + bf_ref[...]
    o_ref[...] = _layernorm(y + x.astype(jnp.float32),
                            g_ref[...], b_ref[...]).astype(o_ref.dtype)


def ffn_block(x, lp):
    M, H = x.shape
    I = INTERMEDIATE
    tm = _row_tile(M)
    return pl.pallas_call(
        _ffn_block_kernel,
        out_shape=jax.ShapeDtypeStruct((M, H), ACT_DTYPE),
        grid=(M // tm,),
        in_specs=[
            pl.BlockSpec((tm, H), lambda i: (i, 0)),
            pl.BlockSpec((H, I), lambda i: (0, 0)),       # Wi (bf16)
            pl.BlockSpec((1, I), lambda i: (0, 0)),
            pl.BlockSpec((I, H), lambda i: (0, 0)),       # Wf (bf16)
            pl.BlockSpec((1, H), lambda i: (0, 0)),
            pl.BlockSpec((1, H), lambda i: (0, 0)),
            pl.BlockSpec((1, H), lambda i: (0, 0)),
        ],
        out_specs=pl.BlockSpec((tm, H), lambda i: (i, 0)),
        compiler_params=pltpu.CompilerParams(dimension_semantics=("parallel",)),
    )(x, lp["wi"], lp["bi"], lp["wf"], lp["bf"],
      lp["ln2_g"].reshape(1, H), lp["ln2_b"].reshape(1, H))


# ============================ model glue ============================

def init_params(key):
    keys = jax.random.split(key, 8 + 8 * NUM_LAYERS)
    it = iter(range(len(keys)))

    def nrm(shape):
        return 0.02 * jax.random.normal(keys[next(it)], shape, dtype=jnp.float32)

    params = {
        "word_emb": nrm((VOCAB, HIDDEN)),
        "pos_emb": nrm((MAX_POS, HIDDEN)),
        "type_emb": nrm((TYPE_VOCAB, HIDDEN)),
        "emb_ln_g": jnp.ones((HIDDEN,), jnp.float32),
        "emb_ln_b": jnp.zeros((HIDDEN,), jnp.float32),
        "pool_w": nrm((HIDDEN, HIDDEN)),
        "pool_b": jnp.zeros((HIDDEN,), jnp.float32),
        "cls_w": nrm((HIDDEN, NUM_LABELS)),
        "cls_b": jnp.zeros((NUM_LABELS,), jnp.float32),
        "layers": [],
    }
    inv_sqrt_dh = 1.0 / math.sqrt(HEAD_DIM)
    for _ in range(NUM_LAYERS):
        # Fold the 1/sqrt(head_dim) attention scale into the Q weight/bias
        # (a real checkpoint load would do the same fold at conversion time).
        wq = nrm((HIDDEN, HIDDEN)) * inv_sqrt_dh
        wk = nrm((HIDDEN, HIDDEN))
        wv = nrm((HIDDEN, HIDDEN))
        params["layers"].append({
            # Fused QKV weight: columns [0:H]=Q (pre-scaled), [H:2H]=K, [2H:3H]=V.
            "wqkv": jnp.concatenate([wq, wk, wv], axis=1).astype(ACT_DTYPE),
            "bqkv": jnp.zeros((1, 3 * HIDDEN), jnp.float32),
            "wo": nrm((HIDDEN, HIDDEN)).astype(ACT_DTYPE),
            "bo": jnp.zeros((1, HIDDEN), jnp.float32),
            "ln1_g": jnp.ones((HIDDEN,), jnp.float32),
            "ln1_b": jnp.zeros((HIDDEN,), jnp.float32),
            "wi": nrm((HIDDEN, INTERMEDIATE)).astype(ACT_DTYPE),
            "bi": jnp.zeros((1, INTERMEDIATE), jnp.float32),
            "wf": nrm((INTERMEDIATE, HIDDEN)).astype(ACT_DTYPE),
            "bf": jnp.zeros((1, HIDDEN), jnp.float32),
            "ln2_g": jnp.ones((HIDDEN,), jnp.float32),
            "ln2_b": jnp.zeros((HIDDEN,), jnp.float32),
        })
    return params


def bert_forward(params, input_ids, labels=None):
    """Mirrors BERT.forward(text, label): returns (loss, logits)."""
    B, S = input_ids.shape
    H = HIDDEN
    M = B * S

    # --- embeddings: token-id gather is XLA glue; sum + LayerNorm fused in Pallas ---
    we = jnp.take(params["word_emb"], input_ids, axis=0)          # (B,S,H) f32
    pe = params["pos_emb"][:S]                                    # position ids 0..S-1
    te = params["type_emb"][0].reshape(1, H)                      # token_type_ids = 0
    x = embed_layernorm(we, pe, te, params["emb_ln_g"], params["emb_ln_b"],
                        batch=B, seq=S).reshape(M, H)             # bf16 (M,H)
    # dropout layers are identity in eval mode

    for lp in params["layers"]:
        x = attention_block(x, lp, batch=B, seq=S)   # fused attn + residual + LN
        x = ffn_block(x, lp)                         # fused FFN + residual + LN

    # --- pooler ([CLS] -> dense -> tanh) + classifier + loss: sub-vreg shapes,
    #     keep in plain JAX (a pallas_call here is pure launch/DMA overhead) ---
    cls = x.reshape(B, S, H)[:, 0, :].astype(jnp.float32)         # (B,H)
    pooled = jnp.tanh(cls @ params["pool_w"] + params["pool_b"])
    logits = pooled @ params["cls_w"] + params["cls_b"]           # (B, NUM_LABELS)

    loss = None
    if labels is not None:
        logp = jax.nn.log_softmax(logits, axis=-1)
        loss = -jnp.mean(jnp.take_along_axis(logp, labels[:, None], axis=-1))
    return loss, logits


if __name__ == "__main__":
    key = jax.random.PRNGKey(0)
    pkey, dkey, lkey = jax.random.split(key, 3)
    params = init_params(pkey)

    B, S = 2, 8
    text = jax.random.randint(dkey, (B, S), 0, VOCAB, dtype=jnp.int32)
    label = jax.random.randint(lkey, (B,), 0, NUM_LABELS, dtype=jnp.int32)

    fwd = jax.jit(bert_forward)

    # with labels -> (loss, logits)
    loss, logits = fwd(params, text, label)
    jax.block_until_ready((loss, logits))
    assert logits.shape == (B, NUM_LABELS)
    assert bool(jnp.isfinite(loss))

    # without labels -> (None, logits)
    loss_none, logits2 = fwd(params, text, None)
    jax.block_until_ready(logits2)
    assert loss_none is None
    assert logits2.shape == (B, NUM_LABELS)

    print("KERNEL_OK")
</pallas_src>

<mosaic_0001>
module attributes {stable_mosaic.version = 11 : i64} {
  func.func @_emb_ln_kernel(%arg0: i32, %arg1: memref<1x8x32xf32, #tpu.memory_space<vmem>>, %arg2: memref<8x32xf32, #tpu.memory_space<vmem>>, %arg3: memref<1x32xf32, #tpu.memory_space<vmem>>, %arg4: memref<1x32xf32, #tpu.memory_space<vmem>>, %arg5: memref<1x32xf32, #tpu.memory_space<vmem>>, %arg6: memref<1x8x32xbf16, #tpu.memory_space<vmem>>) attributes {dimension_semantics = [#tpu.dimension_semantics<parallel>], iteration_bounds = array<i64: 2>, scalar_prefetch = 0 : i64, scratch_operands = 0 : i64, tpu.core_type = #tpu.core_type<tc>, window_params = [{transform_indices = @transform_0, window_bounds = array<i64: 1, 8, 32>}, {pipeline_mode = #tpu.pipeline_mode<synchronous>, transform_indices = @transform_1, window_bounds = array<i64: 8, 32>}, {pipeline_mode = #tpu.pipeline_mode<synchronous>, transform_indices = @transform_2, window_bounds = array<i64: 1, 32>}, {pipeline_mode = #tpu.pipeline_mode<synchronous>, transform_indices = @transform_3, window_bounds = array<i64: 1, 32>}, {pipeline_mode = #tpu.pipeline_mode<synchronous>, transform_indices = @transform_4, window_bounds = array<i64: 1, 32>}, {transform_indices = @transform_5, window_bounds = array<i64: 1, 8, 32>}]} {
    %c0 = arith.constant 0 : index
    %c0_0 = arith.constant 0 : index
    %c0_1 = arith.constant 0 : index
    %0 = vector.load %arg1[%c0, %c0_0, %c0_1] : memref<1x8x32xf32, #tpu.memory_space<vmem>>, vector<1x8x32xf32>
    %1 = vector.shape_cast %0 : vector<1x8x32xf32> to vector<8x32xf32>
    %c0_2 = arith.constant 0 : index
    %c0_3 = arith.constant 0 : index
    %2 = vector.load %arg2[%c0_2, %c0_3] : memref<8x32xf32, #tpu.memory_space<vmem>>, vector<8x32xf32>
    %3 = arith.addf %1, %2 : vector<8x32xf32>
    %c0_4 = arith.constant 0 : index
    %c0_5 = arith.constant 0 : index
    %4 = vector.load %arg3[%c0_4, %c0_5] : memref<1x32xf32, #tpu.memory_space<vmem>>, vector<1x32xf32>
    %5 = vector.broadcast %4 : vector<1x32xf32> to vector<8x32xf32>
    %6 = arith.addf %3, %5 : vector<8x32xf32>
    %c0_6 = arith.constant 0 : index
    %c0_7 = arith.constant 0 : index
    %7 = vector.load %arg4[%c0_6, %c0_7] : memref<1x32xf32, #tpu.memory_space<vmem>>, vector<1x32xf32>
    %c0_8 = arith.constant 0 : index
    %c0_9 = arith.constant 0 : index
    %8 = vector.load %arg5[%c0_8, %c0_9] : memref<1x32xf32, #tpu.memory_space<vmem>>, vector<1x32xf32>
    %cst = arith.constant dense<0.000000e+00> : vector<8xf32>
    %9 = vector.multi_reduction <add>, %6, %cst [1] : vector<8x32xf32> to vector<8xf32>
    %10 = vector.shape_cast %9 : vector<8xf32> to vector<8x1xf32>
    %cst_10 = arith.constant 3.200000e+01 : f32
    %11 = vector.broadcast %cst_10 : f32 to vector<8x1xf32>
    %12 = arith.divf %10, %11 : vector<8x1xf32>
    %13 = vector.broadcast %12 : vector<8x1xf32> to vector<8x32xf32>
    %14 = arith.subf %6, %13 : vector<8x32xf32>
    %15 = arith.mulf %14, %14 : vector<8x32xf32>
    %cst_11 = arith.constant dense<0.000000e+00> : vector<8xf32>
    %16 = vector.multi_reduction <add>, %15, %cst_11 [1] : vector<8x32xf32> to vector<8xf32>
    %17 = vector.shape_cast %16 : vector<8xf32> to vector<8x1xf32>
    %cst_12 = arith.constant 3.200000e+01 : f32
    %18 = vector.broadcast %cst_12 : f32 to vector<8x1xf32>
    %19 = arith.divf %17, %18 : vector<8x1xf32>
    %cst_13 = arith.constant 9.99999996E-13 : f32
    %20 = vector.broadcast %cst_13 : f32 to vector<8x1xf32>
    %21 = arith.addf %19, %20 : vector<8x1xf32>
    %22 = math.rsqrt %21 : vector<8x1xf32>
    %23 = vector.broadcast %12 : vector<8x1xf32> to vector<8x32xf32>
    %24 = arith.subf %6, %23 : vector<8x32xf32>
    %25 = vector.broadcast %22 : vector<8x1xf32> to vector<8x32xf32>
    %26 = arith.mulf %24, %25 : vector<8x32xf32>
    %27 = vector.broadcast %7 : vector<1x32xf32> to vector<8x32xf32>
    %28 = arith.mulf %26, %27 : vector<8x32xf32>
    %29 = vector.broadcast %8 : vector<1x32xf32> to vector<8x32xf32>
    %30 = arith.addf %28, %29 : vector<8x32xf32>
    %31 = arith.truncf %30 : vector<8x32xf32> to vector<8x32xbf16>
    %c0_14 = arith.constant 0 : index
    %c0_15 = arith.constant 0 : index
    %c0_16 = arith.constant 0 : index
    %32 = vector.load %arg6[%c0_14, %c0_15, %c0_16] : memref<1x8x32xbf16, #tpu.memory_space<vmem>>, vector<1x8x32xbf16>
    %33 = vector.shape_cast %32 : vector<1x8x32xbf16> to vector<8x32xbf16>
    %34 = vector.shape_cast %31 : vector<8x32xbf16> to vector<1x8x32xbf16>
    tpu.vector_store %arg6[%c0_14, %c0_15, %c0_16], %34 {strides = array<i32>} : memref<1x8x32xbf16, #tpu.memory_space<vmem>>, vector<1x8x32xbf16>,
    return
  }
  func.func @transform_0(%arg0: i32) -> (i32, i32, i32) {
    %c0_i32 = arith.constant 0 : i32
    %c0_i32_0 = arith.constant 0 : i32
    %c0_i32_1 = arith.constant 0 : i32
    return %arg0, %c0_i32, %c0_i32_0 : i32, i32, i32
  }
  func.func @transform_1(%arg0: i32) -> (i32, i32) {
    %c0_i32 = arith.constant 0 : i32
    %c0_i32_0 = arith.constant 0 : i32
    %c0_i32_1 = arith.constant 0 : i32
    return %c0_i32, %c0_i32_0 : i32, i32
  }
  func.func @transform_2(%arg0: i32) -> (i32, i32) {
    %c0_i32 = arith.constant 0 : i32
    %c0_i32_0 = arith.constant 0 : i32
    %c0_i32_1 = arith.constant 0 : i32
    return %c0_i32, %c0_i32_0 : i32, i32
  }
  func.func @transform_3(%arg0: i32) -> (i32, i32) {
    %c0_i32 = arith.constant 0 : i32
    %c0_i32_0 = arith.constant 0 : i32
    %c0_i32_1 = arith.constant 0 : i32
    return %c0_i32, %c0_i32_0 : i32, i32
  }
  func.func @transform_4(%arg0: i32) -> (i32, i32) {
    %c0_i32 = arith.constant 0 : i32
    %c0_i32_0 = arith.constant 0 : i32
    %c0_i32_1 = arith.constant 0 : i32
    return %c0_i32, %c0_i32_0 : i32, i32
  }
  func.func @transform_5(%arg0: i32) -> (i32, i32, i32) {
    %c0_i32 = arith.constant 0 : i32
    %c0_i32_0 = arith.constant 0 : i32
    %c0_i32_1 = arith.constant 0 : i32
    return %arg0, %c0_i32, %c0_i32_0 : i32, i32, i32
  }
}

module attributes {stable_mosaic.version = 11 : i64} {
  func.func @_attn_block_kernel(%arg0: i32, %arg1: memref<1x8x32xbf16, #tpu.memory_space<vmem>>, %arg2: memref<32x96xbf16, #tpu.memory_space<vmem>>, %arg3: memref<1x96xf32, #tpu.memory_space<vmem>>, %arg4: memref<32x32xbf16, #tpu.memory_space<vmem>>, %arg5: memref<1x32xf32, #tpu.memory_space<vmem>>, %arg6: memref<1x32xf32, #tpu.memory_space<vmem>>, %arg7: memref<1x32xf32, #tpu.memory_space<vmem>>, %arg8: memref<1x8x32xbf16, #tpu.memory_space<vmem>>) attributes {dimension_semantics = [#tpu.dimension_semantics<parallel>], iteration_bounds = array<i64: 2>, scalar_prefetch = 0 : i64, scratch_operands = 0 : i64, tpu.core_type = #tpu.core_type<tc>, window_params = [{transform_indices = @transform_0, window_bounds = array<i64: 1, 8, 32>}, {pipeline_mode = #tpu.pipeline_mode<synchronous>, transform_indices = @transform_1, window_bounds = array<i64: 32, 96>}, {pipeline_mode = #tpu.pipeline_mode<synchronous>, transform_indices = @transform_2, window_bounds = array<i64: 1, 96>}, {pipeline_mode = #tpu.pipeline_mode<synchronous>, transform_indices = @transform_3, window_bounds = array<i64: 32, 32>}, {pipeline_mode = #tpu.pipeline_mode<synchronous>, transform_indices = @transform_4, window_bounds = array<i64: 1, 32>}, {pipeline_mode = #tpu.pipeline_mode<synchronous>, transform_indices = @transform_5, window_bounds = array<i64: 1, 32>}, {pipeline_mode = #tpu.pipeline_mode<synchronous>, transform_indices = @transform_6, window_bounds = array<i64: 1, 32>}, {transform_indices = @transform_7, window_bounds = array<i64: 1, 8, 32>}]} {
    %c0 = arith.constant 0 : index
    %c0_0 = arith.constant 0 : index
    %c0_1 = arith.constant 0 : index
    %0 = vector.load %arg1[%c0, %c0_0, %c0_1] : memref<1x8x32xbf16, #tpu.memory_space<vmem>>, vector<1x8x32xbf16>
    %1 = vector.shape_cast %0 : vector<1x8x32xbf16> to vector<8x32xbf16>
    %c0_2 = arith.constant 0 : index
    %c0_3 = arith.constant 0 : index
    %2 = vector.load %arg2[%c0_2, %c0_3] : memref<32x96xbf16, #tpu.memory_space<vmem>>, vector<32x96xbf16>
    %cst = arith.constant dense<0.000000e+00> : vector<8x96xf32>
    %3 = tpu.matmul %1, %2, %cst {dimension_numbers = #tpu.dot_dimension_numbers<[1], [0], [0], [1], [0, 0, 1, 1], [], []>} : vector<8x32xbf16>, vector<32x96xbf16>, vector<8x96xf32> -> vector<8x96xf32>
    %c0_4 = arith.constant 0 : index
    %c0_5 = arith.constant 0 : index
    %4 = vector.load %arg3[%c0_4, %c0_5] : memref<1x96xf32, #tpu.memory_space<vmem>>, vector<1x96xf32>
    %5 = vector.broadcast %4 : vector<1x96xf32> to vector<8x96xf32>
    %6 = arith.addf %3, %5 : vector<8x96xf32>
    %7 = vector.extract_strided_slice %6 {offsets = [0, 0], sizes = [8, 8], strides = [1, 1]} : vector<8x96xf32> to vector<8x8xf32>
    %8 = arith.truncf %7 : vector<8x8xf32> to vector<8x8xbf16>
    %9 = vector.extract_strided_slice %6 {offsets = [0, 32], sizes = [8, 8], strides = [1, 1]} : vector<8x96xf32> to vector<8x8xf32>
    %10 = arith.truncf %9 : vector<8x8xf32> to vector<8x8xbf16>
    %11 = vector.extract_strided_slice %6 {offsets = [0, 64], sizes = [8, 8], strides = [1, 1]} : vector<8x96xf32> to vector<8x8xf32>
    %12 = arith.truncf %11 : vector<8x8xf32> to vector<8x8xbf16>
    "tpu.trace_start"() <{level = 10 : i32, message = "qd,kd->qk"}> : () -> ()
    %cst_6 = arith.constant dense<0.000000e+00> : vector<8x8xf32>
    %13 = tpu.matmul %8, %10, %cst_6 {dimension_numbers = #tpu.dot_dimension_numbers<[1], [1], [0], [0], [0, 0, 1, 0], [], []>} : vector<8x8xbf16>, vector<8x8xbf16>, vector<8x8xf32> -> vector<8x8xf32>
    "tpu.trace_stop"() : () -> ()
    %cst_7 = arith.constant dense<0xFF800000> : vector<8xf32>
    %14 = vector.multi_reduction <maximumf>, %13, %cst_7 [1] : vector<8x8xf32> to vector<8xf32>
    %15 = vector.shape_cast %14 : vector<8xf32> to vector<8x1xf32>
    %16 = vector.broadcast %15 : vector<8x1xf32> to vector<8x8xf32>
    %17 = arith.subf %13, %16 : vector<8x8xf32>
    %18 = math.exp %17 : vector<8x8xf32>
    %cst_8 = arith.constant dense<0.000000e+00> : vector<8xf32>
    %19 = vector.multi_reduction <add>, %18, %cst_8 [1] : vector<8x8xf32> to vector<8xf32>
    %20 = vector.shape_cast %19 : vector<8xf32> to vector<8x1xf32>
    %21 = tpu.reciprocal %20 {approx = true} : vector<8x1xf32> -> vector<8x1xf32>
    %22 = vector.broadcast %21 : vector<8x1xf32> to vector<8x8xf32>
    %23 = arith.mulf %18, %22 : vector<8x8xf32>
    %24 = arith.truncf %23 : vector<8x8xf32> to vector<8x8xbf16>
    %cst_9 = arith.constant dense<0.000000e+00> : vector<8x8xf32>
    %25 = tpu.matmul %24, %12, %cst_9 {dimension_numbers = #tpu.dot_dimension_numbers<[1], [0], [0], [1], [0, 0, 1, 1], [], []>} : vector<8x8xbf16>, vector<8x8xbf16>, vector<8x8xf32> -> vector<8x8xf32>
    %26 = vector.extract_strided_slice %6 {offsets = [0, 8], sizes = [8, 8], strides = [1, 1]} : vector<8x96xf32> to vector<8x8xf32>
    %27 = arith.truncf %26 : vector<8x8xf32> to vector<8x8xbf16>
    %28 = vector.extract_strided_slice %6 {offsets = [0, 40], sizes = [8, 8], strides = [1, 1]} : vector<8x96xf32> to vector<8x8xf32>
    %29 = arith.truncf %28 : vector<8x8xf32> to vector<8x8xbf16>
    %30 = vector.extract_strided_slice %6 {offsets = [0, 72], sizes = [8, 8], strides = [1, 1]} : vector<8x96xf32> to vector<8x8xf32>
    %31 = arith.truncf %30 : vector<8x8xf32> to vector<8x8xbf16>
    "tpu.trace_start"() <{level = 10 : i32, message = "qd,kd->qk"}> : () -> ()
    %cst_10 = arith.constant dense<0.000000e+00> : vector<8x8xf32>
    %32 = tpu.matmul %27, %29, %cst_10 {dimension_numbers = #tpu.dot_dimension_numbers<[1], [1], [0], [0], [0, 0, 1, 0], [], []>} : vector<8x8xbf16>, vector<8x8xbf16>, vector<8x8xf32> -> vector<8x8xf32>
    "tpu.trace_stop"() : () -> ()
    %cst_11 = arith.constant dense<0xFF800000> : vector<8xf32>
    %33 = vector.multi_reduction <maximumf>, %32, %cst_11 [1] : vector<8x8xf32> to vector<8xf32>
    %34 = vector.shape_cast %33 : vector<8xf32> to vector<8x1xf32>
    %35 = vector.broadcast %34 : vector<8x1xf32> to vector<8x8xf32>
    %36 = arith.subf %32, %35 : vector<8x8xf32>
    %37 = math.exp %36 : vector<8x8xf32>
    %cst_12 = arith.constant dense<0.000000e+00> : vector<8xf32>
    %38 = vector.multi_reduction <add>, %37, %cst_12 [1] : vector<8x8xf32> to vector<8xf32>
    %39 = vector.shape_cast %38 : vector<8xf32> to vector<8x1xf32>
    %40 = tpu.reciprocal %39 {approx = true} : vector<8x1xf32> -> vector<8x1xf32>
    %41 = vector.broadcast %40 : vector<8x1xf32> to vector<8x8xf32>
    %42 = arith.mulf %37, %41 : vector<8x8xf32>
    %43 = arith.truncf %42 : vector<8x8xf32> to vector<8x8xbf16>
    %cst_13 = arith.constant dense<0.000000e+00> : vector<8x8xf32>
    %44 = tpu.matmul %43, %31, %cst_13 {dimension_numbers = #tpu.dot_dimension_numbers<[1], [0], [0], [1], [0, 0, 1, 1], [], []>} : vector<8x8xbf16>, vector<8x8xbf16>, vector<8x8xf32> -> vector<8x8xf32>
    %45 = vector.extract_strided_slice %6 {offsets = [0, 16], sizes = [8, 8], strides = [1, 1]} : vector<8x96xf32> to vector<8x8xf32>
    %46 = arith.truncf %45 : vector<8x8xf32> to vector<8x8xbf16>
    %47 = vector.extract_strided_slice %6 {offsets = [0, 48], sizes = [8, 8], strides = [1, 1]} : vector<8x96xf32> to vector<8x8xf32>
    %48 = arith.truncf %47 : vector<8x8xf32> to vector<8x8xbf16>
    %49 = vector.extract_strided_slice %6 {offsets = [0, 80], sizes = [8, 8], strides = [1, 1]} : vector<8x96xf32> to vector<8x8xf32>
    %50 = arith.truncf %49 : vector<8x8xf32> to vector<8x8xbf16>
    "tpu.trace_start"() <{level = 10 : i32, message = "qd,kd->qk"}> : () -> ()
    %cst_14 = arith.constant dense<0.000000e+00> : vector<8x8xf32>
    %51 = tpu.matmul %46, %48, %cst_14 {dimension_numbers = #tpu.dot_dimension_numbers<[1], [1], [0], [0], [0, 0, 1, 0], [], []>} : vector<8x8xbf16>, vector<8x8xbf16>, vector<8x8xf32> -> vector<8x8xf32>
    "tpu.trace_stop"() : () -> ()
    %cst_15 = arith.constant dense<0xFF800000> : vector<8xf32>
    %52 = vector.multi_reduction <maximumf>, %51, %cst_15 [1] : vector<8x8xf32> to vector<8xf32>
    %53 = vector.shape_cast %52 : vector<8xf32> to vector<8x1xf32>
    %54 = vector.broadcast %53 : vector<8x1xf32> to vector<8x8xf32>
    %55 = arith.subf %51, %54 : vector<8x8xf32>
    %56 = math.exp %55 : vector<8x8xf32>
    %cst_16 = arith.constant dense<0.000000e+00> : vector<8xf32>
    %57 = vector.multi_reduction <add>, %56, %cst_16 [1] : vector<8x8xf32> to vector<8xf32>
    %58 = vector.shape_cast %57 : vector<8xf32> to vector<8x1xf32>
    %59 = tpu.reciprocal %58 {approx = true} : vector<8x1xf32> -> vector<8x1xf32>
    %60 = vector.broadcast %59 : vector<8x1xf32> to vector<8x8xf32>
    %61 = arith.mulf %56, %60 : vector<8x8xf32>
    %62 = arith.truncf %61 : vector<8x8xf32> to vector<8x8xbf16>
    %cst_17 = arith.constant dense<0.000000e+00> : vector<8x8xf32>
    %63 = tpu.matmul %62, %50, %cst_17 {dimension_numbers = #tpu.dot_dimension_numbers<[1], [0], [0], [1], [0, 0, 1, 1], [], []>} : vector<8x8xbf16>, vector<8x8xbf16>, vector<8x8xf32> -> vector<8x8xf32>
    %64 = vector.extract_strided_slice %6 {offsets = [0, 24], sizes = [8, 8], strides = [1, 1]} : vector<8x96xf32> to vector<8x8xf32>
    %65 = arith.truncf %64 : vector<8x8xf32> to vector<8x8xbf16>
    %66 = vector.extract_strided_slice %6 {offsets = [0, 56], sizes = [8, 8], strides = [1, 1]} : vector<8x96xf32> to vector<8x8xf32>
    %67 = arith.truncf %66 : vector<8x8xf32> to vector<8x8xbf16>
    %68 = vector.extract_strided_slice %6 {offsets = [0, 88], sizes = [8, 8], strides = [1, 1]} : vector<8x96xf32> to vector<8x8xf32>
    %69 = arith.truncf %68 : vector<8x8xf32> to vector<8x8xbf16>
    "tpu.trace_start"() <{level = 10 : i32, message = "qd,kd->qk"}> : () -> ()
    %cst_18 = arith.constant dense<0.000000e+00> : vector<8x8xf32>
    %70 = tpu.matmul %65, %67, %cst_18 {dimension_numbers = #tpu.dot_dimension_numbers<[1], [1], [0], [0], [0, 0, 1, 0], [], []>} : vector<8x8xbf16>, vector<8x8xbf16>, vector<8x8xf32> -> vector<8x8xf32>
    "tpu.trace_stop"() : () -> ()
    %cst_19 = arith.constant dense<0xFF800000> : vector<8xf32>
    %71 = vector.multi_reduction <maximumf>, %70, %cst_19 [1] : vector<8x8xf32> to vector<8xf32>
    %72 = vector.shape_cast %71 : vector<8xf32> to vector<8x1xf32>
    %73 = vector.broadcast %72 : vector<8x1xf32> to vector<8x8xf32>
    %74 = arith.subf %70, %73 : vector<8x8xf32>
    %75 = math.exp %74 : vector<8x8xf32>
    %cst_20 = arith.constant dense<0.000000e+00> : vector<8xf32>
    %76 = vector.multi_reduction <add>, %75, %cst_20 [1] : vector<8x8xf32> to vector<8xf32>
    %77 = vector.shape_cast %76 : vector<8xf32> to vector<8x1xf32>
    %78 = tpu.reciprocal %77 {approx = true} : vector<8x1xf32> -> vector<8x1xf32>
    %79 = vector.broadcast %78 : vector<8x1xf32> to vector<8x8xf32>
    %80 = arith.mulf %75, %79 : vector<8x8xf32>
    %81 = arith.truncf %80 : vector<8x8xf32> to vector<8x8xbf16>
    %cst_21 = arith.constant dense<0.000000e+00> : vector<8x8xf32>
    %82 = tpu.matmul %81, %69, %cst_21 {dimension_numbers = #tpu.dot_dimension_numbers<[1], [0], [0], [1], [0, 0, 1, 1], [], []>} : vector<8x8xbf16>, vector<8x8xbf16>, vector<8x8xf32> -> vector<8x8xf32>
    %83 = tpu.concatenate %25, %44, %63, %82 in 1 : vector<8x8xf32>, vector<8x8xf32>, vector<8x8xf32>, vector<8x8xf32> -> vector<8x32xf32>
    %84 = arith.truncf %83 : vector<8x32xf32> to vector<8x32xbf16>
    %c0_22 = arith.constant 0 : index
    %c0_23 = arith.constant 0 : index
    %85 = vector.load %arg4[%c0_22, %c0_23] : memref<32x32xbf16, #tpu.memory_space<vmem>>, vector<32x32xbf16>
    %cst_24 = arith.constant dense<0.000000e+00> : vector<8x32xf32>
    %86 = tpu.matmul %84, %85, %cst_24 {dimension_numbers = #tpu.dot_dimension_numbers<[1], [0], [0], [1], [0, 0, 1, 1], [], []>} : vector<8x32xbf16>, vector<32x32xbf16>, vector<8x32xf32> -> vector<8x32xf32>
    %c0_25 = arith.constant 0 : index
    %c0_26 = arith.constant 0 : index
    %87 = vector.load %arg5[%c0_25, %c0_26] : memref<1x32xf32, #tpu.memory_space<vmem>>, vector<1x32xf32>
    %88 = vector.broadcast %87 : vector<1x32xf32> to vector<8x32xf32>
    %89 = arith.addf %86, %88 : vector<8x32xf32>
    %90 = arith.extf %1 : vector<8x32xbf16> to vector<8x32xf32>
    %91 = arith.addf %89, %90 : vector<8x32xf32>
    %c0_27 = arith.constant 0 : index
    %c0_28 = arith.constant 0 : index
    %92 = vector.load %arg6[%c0_27, %c0_28] : memref<1x32xf32, #tpu.memory_space<vmem>>, vector<1x32xf32>
    %c0_29 = arith.constant 0 : index
    %c0_30 = arith.constant 0 : index
    %93 = vector.load %arg7[%c0_29, %c0_30] : memref<1x32xf32, #tpu.memory_space<vmem>>, vector<1x32xf32>
    %cst_31 = arith.constant dense<0.000000e+00> : vector<8xf32>
    %94 = vector.multi_reduction <add>, %91, %cst_31 [1] : vector<8x32xf32> to vector<8xf32>
    %95 = vector.shape_cast %94 : vector<8xf32> to vector<8x1xf32>
    %cst_32 = arith.constant 3.200000e+01 : f32
    %96 = vector.broadcast %cst_32 : f32 to vector<8x1xf32>
    %97 = arith.divf %95, %96 : vector<8x1xf32>
    %98 = vector.broadcast %97 : vector<8x1xf32> to vector<8x32xf32>
    %99 = arith.subf %91, %98 : vector<8x32xf32>
    %100 = arith.mulf %99, %99 : vector<8x32xf32>
    %cst_33 = arith.constant dense<0.000000e+00> : vector<8xf32>
    %101 = vector.multi_reduction <add>, %100, %cst_33 [1] : vector<8x32xf32> to vector<8xf32>
    %102 = vector.shape_cast %101 : vector<8xf32> to vector<8x1xf32>
    %cst_34 = arith.constant 3.200000e+01 : f32
    %103 = vector.broadcast %cst_34 : f32 to vector<8x1xf32>
    %104 = arith.divf %102, %103 : vector<8x1xf32>
    %cst_35 = arith.constant 9.99999996E-13 : f32
    %105 = vector.broadcast %cst_35 : f32 to vector<8x1xf32>
    %106 = arith.addf %104, %105 : vector<8x1xf32>
    %107 = math.rsqrt %106 : vector<8x1xf32>
    %108 = vector.broadcast %97 : vector<8x1xf32> to vector<8x32xf32>
    %109 = arith.subf %91, %108 : vector<8x32xf32>
    %110 = vector.broadcast %107 : vector<8x1xf32> to vector<8x32xf32>
    %111 = arith.mulf %109, %110 : vector<8x32xf32>
    %112 = vector.broadcast %92 : vector<1x32xf32> to vector<8x32xf32>
    %113 = arith.mulf %111, %112 : vector<8x32xf32>
    %114 = vector.broadcast %93 : vector<1x32xf32> to vector<8x32xf32>
    %115 = arith.addf %113, %114 : vector<8x32xf32>
    %116 = arith.truncf %115 : vector<8x32xf32> to vector<8x32xbf16>
    %c0_36 = arith.constant 0 : index
    %c0_37 = arith.constant 0 : index
    %c0_38 = arith.constant 0 : index
    %117 = vector.load %arg8[%c0_36, %c0_37, %c0_38] : memref<1x8x32xbf16, #tpu.memory_space<vmem>>, vector<1x8x32xbf16>
    %118 = vector.shape_cast %117 : vector<1x8x32xbf16> to vector<8x32xbf16>
    %119 = vector.shape_cast %116 : vector<8x32xbf16> to vector<1x8x32xbf16>
    tpu.vector_store %arg8[%c0_36, %c0_37, %c0_38], %119 {strides = array<i32>} : memref<1x8x32xbf16, #tpu.memory_space<vmem>>, vector<1x8x32xbf16>,
    return
  }
  func.func @transform_0(%arg0: i32) -> (i32, i32, i32) {
    %c0_i32 = arith.constant 0 : i32
    %c0_i32_0 = arith.constant 0 : i32
    %c0_i32_1 = arith.constant 0 : i32
    return %arg0, %c0_i32, %c0_i32_0 : i32, i32, i32
  }
  func.func @transform_1(%arg0: i32) -> (i32, i32) {
    %c0_i32 = arith.constant 0 : i32
    %c0_i32_0 = arith.constant 0 : i32
    %c0_i32_1 = arith.constant 0 : i32
    return %c0_i32, %c0_i32_0 : i32, i32
  }
  func.func @transform_2(%arg0: i32) -> (i32, i32) {
    %c0_i32 = arith.constant 0 : i32
    %c0_i32_0 = arith.constant 0 : i32
    %c0_i32_1 = arith.constant 0 : i32
    return %c0_i32, %c0_i32_0 : i32, i32
  }
  func.func @transform_3(%arg0: i32) -> (i32, i32) {
    %c0_i32 = arith.constant 0 : i32
    %c0_i32_0 = arith.constant 0 : i32
    %c0_i32_1 = arith.constant 0 : i32
    return %c0_i32, %c0_i32_0 : i32, i32
  }
  func.func @transform_4(%arg0: i32) -> (i32, i32) {
    %c0_i32 = arith.constant 0 : i32
    %c0_i32_0 = arith.constant 0 : i32
    %c0_i32_1 = arith.constant 0 : i32
    return %c0_i32, %c0_i32_0 : i32, i32
  }
  func.func @transform_5(%arg0: i32) -> (i32, i32) {
    %c0_i32 = arith.constant 0 : i32
    %c0_i32_0 = arith.constant 0 : i32
    %c0_i32_1 = arith.constant 0 : i32
    return %c0_i32, %c0_i32_0 : i32, i32
  }
  func.func @transform_6(%arg0: i32) -> (i32, i32) {
    %c0_i32 = arith.constant 0 : i32
    %c0_i32_0 = arith.constant 0 : i32
    %c0_i32_1 = arith.constant 0 : i32
    return %c0_i32, %c0_i32_0 : i32, i32
  }
  func.func @transform_7(%arg0: i32) -> (i32, i32, i32) {
    %c0_i32 = arith.constant 0 : i32
    %c0_i32_0 = arith.constant 0 : i32
    %c0_i32_1 = arith.constant 0 : i32
    return %arg0, %c0_i32, %c0_i32_0 : i32, i32, i32
  }
}

module attributes {stable_mosaic.version = 11 : i64} {
  func.func @_ffn_block_kernel(%arg0: i32, %arg1: memref<16x32xbf16, #tpu.memory_space<vmem>>, %arg2: memref<32x128xbf16, #tpu.memory_space<vmem>>, %arg3: memref<1x128xf32, #tpu.memory_space<vmem>>, %arg4: memref<128x32xbf16, #tpu.memory_space<vmem>>, %arg5: memref<1x32xf32, #tpu.memory_space<vmem>>, %arg6: memref<1x32xf32, #tpu.memory_space<vmem>>, %arg7: memref<1x32xf32, #tpu.memory_space<vmem>>, %arg8: memref<16x32xbf16, #tpu.memory_space<vmem>>) attributes {dimension_semantics = [#tpu.dimension_semantics<parallel>], iteration_bounds = array<i64: 1>, scalar_prefetch = 0 : i64, scratch_operands = 0 : i64, tpu.core_type = #tpu.core_type<tc>, window_params = [{transform_indices = @transform_0, window_bounds = array<i64: 16, 32>}, {pipeline_mode = #tpu.pipeline_mode<synchronous>, transform_indices = @transform_1, window_bounds = array<i64: 32, 128>}, {pipeline_mode = #tpu.pipeline_mode<synchronous>, transform_indices = @transform_2, window_bounds = array<i64: 1, 128>}, {pipeline_mode = #tpu.pipeline_mode<synchronous>, transform_indices = @transform_3, window_bounds = array<i64: 128, 32>}, {pipeline_mode = #tpu.pipeline_mode<synchronous>, transform_indices = @transform_4, window_bounds = array<i64: 1, 32>}, {pipeline_mode = #tpu.pipeline_mode<synchronous>, transform_indices = @transform_5, window_bounds = array<i64: 1, 32>}, {pipeline_mode = #tpu.pipeline_mode<synchronous>, transform_indices = @transform_6, window_bounds = array<i64: 1, 32>}, {transform_indices = @transform_7, window_bounds = array<i64: 16, 32>}]} {
    %c0 = arith.constant 0 : index
    %c0_0 = arith.constant 0 : index
    %0 = vector.load %arg1[%c0, %c0_0] : memref<16x32xbf16, #tpu.memory_space<vmem>>, vector<16x32xbf16>
    %c0_1 = arith.constant 0 : index
    %c0_2 = arith.constant 0 : index
    %1 = vector.load %arg2[%c0_1, %c0_2] : memref<32x128xbf16, #tpu.memory_space<vmem>>, vector<32x128xbf16>
    %cst = arith.constant dense<0.000000e+00> : vector<16x128xf32>
    %2 = tpu.matmul %0, %1, %cst {dimension_numbers = #tpu.dot_dimension_numbers<[1], [0], [0], [1], [0, 0, 1, 1], [], []>} : vector<16x32xbf16>, vector<32x128xbf16>, vector<16x128xf32> -> vector<16x128xf32>
    %c0_3 = arith.constant 0 : index
    %c0_4 = arith.constant 0 : index
    %3 = vector.load %arg3[%c0_3, %c0_4] : memref<1x128xf32, #tpu.memory_space<vmem>>, vector<1x128xf32>
    %4 = vector.broadcast %3 : vector<1x128xf32> to vector<16x128xf32>
    %5 = arith.addf %2, %4 : vector<16x128xf32>
    %cst_5 = arith.constant 5.000000e-01 : f32
    %6 = vector.broadcast %cst_5 : f32 to vector<16x128xf32>
    %7 = arith.mulf %6, %5 : vector<16x128xf32>
    %cst_6 = arith.constant 0.707106769 : f32
    %8 = vector.broadcast %cst_6 : f32 to vector<16x128xf32>
    %9 = arith.mulf %5, %8 : vector<16x128xf32>
    %10 = math.erf %9 : vector<16x128xf32>
    %cst_7 = arith.constant 1.000000e+00 : f32
    %11 = vector.broadcast %cst_7 : f32 to vector<16x128xf32>
    %12 = arith.addf %11, %10 : vector<16x128xf32>
    %13 = arith.mulf %7, %12 : vector<16x128xf32>
    %14 = arith.truncf %13 : vector<16x128xf32> to vector<16x128xbf16>
    %c0_8 = arith.constant 0 : index
    %c0_9 = arith.constant 0 : index
    %15 = vector.load %arg4[%c0_8, %c0_9] : memref<128x32xbf16, #tpu.memory_space<vmem>>, vector<128x32xbf16>
    %cst_10 = arith.constant dense<0.000000e+00> : vector<16x32xf32>
    %16 = tpu.matmul %14, %15, %cst_10 {dimension_numbers = #tpu.dot_dimension_numbers<[1], [0], [0], [1], [0, 0, 1, 1], [], []>} : vector<16x128xbf16>, vector<128x32xbf16>, vector<16x32xf32> -> vector<16x32xf32>
    %c0_11 = arith.constant 0 : index
    %c0_12 = arith.constant 0 : index
    %17 = vector.load %arg5[%c0_11, %c0_12] : memref<1x32xf32, #tpu.memory_space<vmem>>, vector<1x32xf32>
    %18 = vector.broadcast %17 : vector<1x32xf32> to vector<16x32xf32>
    %19 = arith.addf %16, %18 : vector<16x32xf32>
    %20 = arith.extf %0 : vector<16x32xbf16> to vector<16x32xf32>
    %21 = arith.addf %19, %20 : vector<16x32xf32>
    %c0_13 = arith.constant 0 : index
    %c0_14 = arith.constant 0 : index
    %22 = vector.load %arg6[%c0_13, %c0_14] : memref<1x32xf32, #tpu.memory_space<vmem>>, vector<1x32xf32>
    %c0_15 = arith.constant 0 : index
    %c0_16 = arith.constant 0 : index
    %23 = vector.load %arg7[%c0_15, %c0_16] : memref<1x32xf32, #tpu.memory_space<vmem>>, vector<1x32xf32>
    %cst_17 = arith.constant dense<0.000000e+00> : vector<16xf32>
    %24 = vector.multi_reduction <add>, %21, %cst_17 [1] : vector<16x32xf32> to vector<16xf32>
    %25 = vector.shape_cast %24 : vector<16xf32> to vector<16x1xf32>
    %cst_18 = arith.constant 3.200000e+01 : f32
    %26 = vector.broadcast %cst_18 : f32 to vector<16x1xf32>
    %27 = arith.divf %25, %26 : vector<16x1xf32>
    %28 = vector.broadcast %27 : vector<16x1xf32> to vector<16x32xf32>
    %29 = arith.subf %21, %28 : vector<16x32xf32>
    %30 = arith.mulf %29, %29 : vector<16x32xf32>
    %cst_19 = arith.constant dense<0.000000e+00> : vector<16xf32>
    %31 = vector.multi_reduction <add>, %30, %cst_19 [1] : vector<16x32xf32> to vector<16xf32>
    %32 = vector.shape_cast %31 : vector<16xf32> to vector<16x1xf32>
    %cst_20 = arith.constant 3.200000e+01 : f32
    %33 = vector.broadcast %cst_20 : f32 to vector<16x1xf32>
    %34 = arith.divf %32, %33 : vector<16x1xf32>
    %cst_21 = arith.constant 9.99999996E-13 : f32
    %35 = vector.broadcast %cst_21 : f32 to vector<16x1xf32>
    %36 = arith.addf %34, %35 : vector<16x1xf32>
    %37 = math.rsqrt %36 : vector<16x1xf32>
    %38 = vector.broadcast %27 : vector<16x1xf32> to vector<16x32xf32>
    %39 = arith.subf %21, %38 : vector<16x32xf32>
    %40 = vector.broadcast %37 : vector<16x1xf32> to vector<16x32xf32>
    %41 = arith.mulf %39, %40 : vector<16x32xf32>
    %42 = vector.broadcast %22 : vector<1x32xf32> to vector<16x32xf32>
    %43 = arith.mulf %41, %42 : vector<16x32xf32>
    %44 = vector.broadcast %23 : vector<1x32xf32> to vector<16x32xf32>
    %45 = arith.addf %43, %44 : vector<16x32xf32>
    %46 = arith.truncf %45 : vector<16x32xf32> to vector<16x32xbf16>
    %c0_22 = arith.constant 0 : index
    %c0_23 = arith.constant 0 : index
    %47 = vector.load %arg8[%c0_22, %c0_23] : memref<16x32xbf16, #tpu.memory_space<vmem>>, vector<16x32xbf16>
    tpu.vector_store %arg8[%c0_22, %c0_23], %46 {strides = array<i32>} : memref<16x32xbf16, #tpu.memory_space<vmem>>, vector<16x32xbf16>,
    return
  }
  func.func @transform_0(%arg0: i32) -> (i32, i32) {
    %c0_i32 = arith.constant 0 : i32
    %c0_i32_0 = arith.constant 0 : i32
    return %arg0, %c0_i32 : i32, i32
  }
  func.func @transform_1(%arg0: i32) -> (i32, i32) {
    %c0_i32 = arith.constant 0 : i32
    %c0_i32_0 = arith.constant 0 : i32
    %c0_i32_1 = arith.constant 0 : i32
    return %c0_i32, %c0_i32_0 : i32, i32
  }
  func.func @transform_2(%arg0: i32) -> (i32, i32) {
    %c0_i32 = arith.constant 0 : i32
    %c0_i32_0 = arith.constant 0 : i32
    %c0_i32_1 = arith.constant 0 : i32
    return %c0_i32, %c0_i32_0 : i32, i32
  }
  func.func @transform_3(%arg0: i32) -> (i32, i32) {
    %c0_i32 = arith.constant 0 : i32
    %c0_i32_0 = arith.constant 0 : i32
    %c0_i32_1 = arith.constant 0 : i32
    return %c0_i32, %c0_i32_0 : i32, i32
  }
  func.func @transform_4(%arg0: i32) -> (i32, i32) {
    %c0_i32 = arith.constant 0 : i32
    %c0_i32_0 = arith.constant 0 : i32
    %c0_i32_1 = arith.constant 0 : i32
    return %c0_i32, %c0_i32_0 : i32, i32
  }
  func.func @transform_5(%arg0: i32) -> (i32, i32) {
    %c0_i32 = arith.constant 0 : i32
    %c0_i32_0 = arith.constant 0 : i32
    %c0_i32_1 = arith.constant 0 : i32
    return %c0_i32, %c0_i32_0 : i32, i32
  }
  func.func @transform_6(%arg0: i32) -> (i32, i32) {
    %c0_i32 = arith.constant 0 : i32
    %c0_i32_0 = arith.constant 0 : i32
    %c0_i32_1 = arith.constant 0 : i32
    return %c0_i32, %c0_i32_0 : i32, i32
  }
  func.func @transform_7(%arg0: i32) -> (i32, i32) {
    %c0_i32 = arith.constant 0 : i32
    %c0_i32_0 = arith.constant 0 : i32
    return %arg0, %c0_i32 : i32, i32
  }
}

</mosaic_0001>

<bundles_post_ra>
// kernel: bert_forward.7
= control target key start
LH: loop header
LB: loop body
LE: loop exit
PB: predicated region body
PF: predicated region fallthrough
CT: control target
= control target key end

     0   :  { %v371_v0 = vmov 0.0   ;;  %vm372_vm0 = vmmov 0   ;;  %vm57_vm1 = vcmask 261120   ;;  %vm282_vm2 = vcmask 257024   ;;  %s474_s1 = inlined_call_operand.vmem [shape: bf16[32,128], index: 1, kind: input, shape index: {}]   ;;  %s475_s0 = inlined_call_operand.vmem [shape: bf16[16,32], index: 0, kind: input, shape index: {}]   ;;  %s476_s3 = inlined_call_operand.vmem [shape: bf16[128,32], index: 3, kind: input, shape index: {}]   ;;  %s477_s2 = inlined_call_operand.vmem [shape: f32[1,128], index: 2, kind: input, shape index: {}]   ;;  %s478_s4 = inlined_call_operand.vmem [shape: f32[1,32], index: 4, kind: input, shape index: {}]   ;;  %s479_s5 = inlined_call_operand.vmem [shape: f32[1,32], index: 5, kind: input, shape index: {}]   ;;  %s480_s6 = inlined_call_operand.vmem [shape: f32[1,32], index: 6, kind: input, shape index: {}]   ;;  %s481_s7 = inlined_call_operand.vmem [shape: bf16[16,32], index: 7, kind: output, shape index: {}]  }
   0x1   :  { %321 = vmatprep.subr.bf16.mxu0 %v371_v0  ;;  %v351_v1 = vld [vmem:[%s474_s1] sm:$0xff]   ;;  %325 = vmatprep.mubr.msk.bf16.mxu0 %vm372_vm0, %v371_v0  ;;  %v352_v2 = vld [vmem:[%s474_s1 + $0x8] sm:$0xff]   ;;  %v356_v6 = vld [vmem:[%s476_s3 + $0x10] sm:$0xff]  }
   0x2   :  { %329 = vmatprep.subr.bf16.mxu1 %v371_v0  ;;  %345 = vmatprep.mubr.msk.bf16.mxu1 %vm372_vm0, %v371_v0  ;;  %v422_v3 = vld [vmem:[%s475_s0] sm:$0xff]   ;;  %v355_v5 = vld [vmem:[%s476_s3 + $0x8] sm:$0xff]   ;;  %v357_v7 = vld [vmem:[%s476_s3 + $0x18] sm:$0xff]  }
   0x3   :  { %322 = vmatpush3.bf16.msra.mxu0 %v351_v1  ;;  %v354_v4 = vld [vmem:[%s476_s3] sm:$0xff]   ;;  %v359_v9 = vld [vmem:[%s476_s3 + $0x28] sm:$0xff]   ;;  %v360_v10 = vld [vmem:[%s476_s3 + $0x30] sm:$0xff]   ;;  %v225_v31 = vunpack.c.l.bf16 %v422_v3  ;;  %v226_v35 = vunpack.c.h.bf16 %v422_v3 }
   0x4   :  { %323 = vmatprep.subr.bf16.mxu0 %v371_v0  ;;  %330 = vmatpush3.bf16.msra.mxu1 %v354_v4  ;;  %v358_v8 = vld [vmem:[%s476_s3 + $0x20] sm:$0xff]   ;;  %v361_v11 = vld [vmem:[%s476_s3 + $0x38] sm:$0xff]  }
   0x5   :  { %331 = vmatprep.subr.bf16.mxu1 %v371_v0  ;;  %v289_v12 = vld [vmem:[%s477_s2] ss:$0 sm:$0xff] }
   0x6   :  { %v294_v30 = vld [vmem:[%s478_s4] ss:$0 sm:$0xff] }
   0x7   :  { %324 = vmatpush3.bf16.msra.mxu0 %v352_v2  ;;  %v303_v60 = vld [vmem:[%s479_s5] ss:$0 sm:$0xff] }
   0x8   :  { %332 = vmatpush3.bf16.msra.mxu1 %v355_v5  ;;  %v304_v62 = vld [vmem:[%s480_s6] ss:$0 sm:$0xff] }
   0x9   :  { %333 = vmatprep.subr.bf16.mxu1 %v371_v0 }
   0xa   :  { %326 = vmatmul.mubr.msk.bf16.vlgmr.msra.gmra.mrb[0].mxu0 %vm57_vm1, %v422_v3 }
   0xc   :  { %334 = vmatpush3.bf16.msra.mxu1 %v356_v6 }
   0xd   :  { %335 = vmatprep.subr.bf16.mxu1 %v371_v0 }
  0x10   :  { %336 = vmatpush3.bf16.msra.mxu1 %v357_v7 }
  0x11   :  { %337 = vmatprep.subr.bf16.mxu1 %v371_v0 }
  0x14   :  { %338 = vmatpush3.bf16.msra.mxu1 %v358_v8 }
  0x15   :  { %339 = vmatprep.subr.bf16.mxu1 %v371_v0 }
  0x18   :  { %340 = vmatpush3.bf16.msra.mxu1 %v359_v9 }
  0x19   :  { %341 = vmatprep.subr.bf16.mxu1 %v371_v0 }
  0x1c   :  { %342 = vmatpush3.bf16.msra.mxu1 %v360_v10 }
  0x1d   :  { %343 = vmatprep.subr.bf16.mxu1 %v371_v0 }
  0x20   :  { %344 = vmatpush3.bf16.msra.mxu1 %v361_v11 }
  0xdd   :  { %v95_v13 = vpop.f32.mrb[0].mxu0 }
  0xde   :  { %v96_v14 = vadd.f32 %v289_v12, %v95_v13  ;;  %v327_v15 = vpop.f32.mrb[1].mxu0 }
  0xdf   :  { %v98_v16 = vpop.f32.mrb[2].mxu0 }
  0xe0   :  { %v104_v17 = vmul.f32 0.70710677, %v96_v14  ;;  %v99_v18 = vadd.f32 %v289_v12, %v98_v16  ;;  %v328_v19 = vpop.f32.mrb[3].mxu0  ;;  %v102_v24 = vmul.f32 0.5, %v96_v14 }
  0xe2   :  { %363 = verf.f32 %v104_v17  ;;  %v105_v20 = vmul.f32 0.70710677, %v99_v18  ;;  %v103_v25 = vmul.f32 0.5, %v99_v18 }
  0xe4   :  { %365 = verf.f32 %v105_v20 }
  0xec   :  { %v364_v21 = vpop.eup %363 }
  0xed   :  { %v108_v22 = vadd.f32 1.0, %v364_v21 }
  0xee   :  { %v366_v23 = vpop.eup %365 }
  0xef   :  { %v109_v26 = vadd.f32 1.0, %v366_v23  ;;  %v110_v27 = vmul.f32 %v108_v22, %v102_v24 }
  0xf1   :  { %v111_v28 = vmul.f32 %v109_v26, %v103_v25 }
  0xf3   :  { %v112_v29 = vpack.c.bf16 %v111_v28, %v110_v27 }
  0xf5   :  { %346 = vmatmul.mubr.bf16.vlgmr.msra.gmra.mrb[0].mxu1 %v112_v29 }
 0x1c8   :  { %v218_v32 = vpop.f32.mrb[0].mxu1 }
 0x1c9   :  { %v219_v33 = vadd.f32 %v294_v30, %v218_v32  ;;  %v347_v34 = vpop.f32.mrb[1].mxu1 }
 0x1ca   :  { %v221_v36 = vpop.f32.mrb[2].mxu1 }
 0x1cb   :  { %v222_v37 = vadd.f32 %v294_v30, %v221_v36  ;;  %v348_v38 = vpop.f32.mrb[3].mxu1  ;;  %v227_v39 = vadd.f32 %v225_v31, %v219_v33 }
 0x1cd   :  { %v231_v40 = vsel %vm57_vm1, %v227_v39, 0.0  ;;  %v228_v41 = vadd.f32 %v226_v35, %v222_v37 }
 0x1ce   :  { %232 = vadd.xlane.f32.xlu0 %v231_v40 }
 0x1cf   :  { %v234_v42 = vsel %vm57_vm1, %v228_v41, 0.0 }
 0x1d2   :  { %235 = vadd.xlane.f32.xlu0 %v234_v42 }
 0x25b   :  { %v233_v43 = vpop.xlane.xlu0 %232 }
 0x25c   :  { %v238_v44 = vmul.f32 0.03125, %v233_v43 }
 0x25e   :  { %v240_v45 = vsub.f32 %v227_v39, %v238_v44 }
 0x25f   :  { %v236_v46 = vpop.xlane.xlu0 %235 }
 0x260   :  { %v239_v47 = vmul.f32 0.03125, %v236_v46  ;;  %v242_v48 = vmul.f32 %v240_v45, %v240_v45 }
 0x262   :  { %v241_v49 = vsub.f32 %v228_v41, %v239_v47  ;;  %v244_v50 = vsel %vm57_vm1, %v242_v48, 0.0 }
 0x263   :  { %245 = vadd.xlane.f32.xlu1 %v244_v50 }
 0x264   :  { %v243_v51 = vmul.f32 %v241_v49, %v241_v49 }
 0x266   :  { %v247_v52 = vsel %vm57_vm1, %v243_v51, 0.0 }
 0x267   :  { %248 = vadd.xlane.f32.xlu1 %v247_v52 }
 0x2f0   :  { %v246_v53 = vpop.xlane.xlu1 %245 }
 0x2f1   :  { %v250_v54 = vmul.f32 0.03125, %v246_v53 }
 0x2f3   :  { %v252_v55 = vadd.f32 1e-12, %v250_v54 }
 0x2f4   :  { %v249_v56 = vpop.xlane.xlu1 %248 }
 0x2f5   :  { %367 = vrsqrt.f32 %v252_v55  ;;  %v251_v57 = vmul.f32 0.03125, %v249_v56 }
 0x2f7   :  { %v253_v58 = vadd.f32 1e-12, %v251_v57 }
 0x2f9   :  { %369 = vrsqrt.f32 %v253_v58 }
 0x2ff   :  { %v368_v59 = vpop.eup %367 }
 0x300   :  { %v256_v61 = vmul.f32 %v368_v59, %v240_v45 }
 0x302   :  { %v264_v63 = vmul.f32 %v303_v60, %v256_v61 }
 0x303   :  { %v370_v0 = vpop.eup %369 }
 0x304   :  { %v272_v1 = vadd.f32 %v304_v62, %v264_v63  ;;  %v257_v2 = vmul.f32 %v370_v0, %v241_v49 }
 0x306   :  { %v307_v3 = vpack.c.bf16 %v272_v1, %v272_v1  ;;  %v265_v4 = vmul.f32 %v303_v60, %v257_v2 }
 0x308   :  { %283 = vst.msk [vmem:[%s481_s7] sm:$0xf] %vm282_vm2, %v307_v3  ;;  %v273_v5 = vadd.f32 %v304_v62, %v265_v4 }
 0x30a   :  { %v308_v6 = vpack.c.bf16 %v273_v5, %v273_v5 }
 0x30c   :  { %284 = vst.msk [vmem:[%s481_s7 + $0x4] sm:$0xf] %vm282_vm2, %v308_v6 }

// kernel: bert_forward.5
= control target key start
LH: loop header
LB: loop body
LE: loop exit
PB: predicated region body
PF: predicated region fallthrough
CT: control target
= control target key end

     0   :  { %s378_s18 = smov 0   ;;  %s411_s0 = inlined_call_operand.vmem [shape: f32[2,8,32], index: 0, kind: input, shape index: {}]   ;;  %s412_s1 = inlined_call_operand.vmem [shape: f32[8,32], index: 1, kind: input, shape index: {}]   ;;  %s413_s2 = inlined_call_operand.vmem [shape: f32[1,32], index: 2, kind: input, shape index: {}]   ;;  %s414_s3 = inlined_call_operand.vmem [shape: f32[1,32], index: 3, kind: input, shape index: {}]   ;;  %s415_s4 = inlined_call_operand.vmem [shape: f32[1,32], index: 4, kind: input, shape index: {}]   ;;  %s416_s5 = inlined_call_operand.vmem [shape: bf16[2,8,32], index: 5, kind: output, shape index: {}]  }
   0x1 LB: > { %s318_s19 = sadd.s32 4294967295, %s346_s18   ;;  %p322_p0 = scmp.ge.s32.totalorder %s346_s18, 1  ;;  %s346_s18 = sphi %s378_s18, %s15_s18  }
   0x2   : > { %p186_p1 = scmp.lt.s32.totalorder %s346_s18, 3 }
   0x4   : > { %p187_p2 = pnand %p322_p0, %p186_p1 }
   0x5   : > { %p212_p3 = scmp.lt.s32.totalorder (!%p187_p2), %s318_s19, 1  ;;  %v221_v0 = vld [vmem:[%s412_s1] sm:$0xff] (!%p187_p2)  ;;  %vm233_vm0 = vcmask (!%p187_p2), 261120   ;;  %vm263_vm1 = vcmask (!%p187_p2), 257024  }
   0x6   : > { %190 = sbr.rel (%p187_p2) target bundleno = 337 (0x151), region = 40  ;;  %v325_v2 = vld [vmem:[%s413_s2] ss:$0 sm:$0xff] (!%p187_p2) }
   0x7   : > { %v326_v15 = vld [vmem:[%s414_s3] ss:$0 sm:$0xff] (!%p187_p2) }
   0x8   : > { %v327_v17 = vld [vmem:[%s415_s4] ss:$0 sm:$0xff] (!%p187_p2) }
   0xd   : > { %s418_s19 = smov (!%p212_p3, %s318_s19), 1 }
   0xe   : > { %s323_s20 = sshll.u32 %s418_s19, 3  ;;  %s324_s7 = sshll.u32 %s418_s19, 2 }
   0xf   : > { %s215_s25 = scalar_lea.vmem %s411_s0, %s323_s20  ;;  %s219_s10 = scalar_lea.vmem %s416_s5, %s324_s7 }
  0x10   : > { %v220_v1 = vld [vmem:[%s215_s25] sm:$0xff] }
  0x11   : > { %v222_v3 = vadd.f32 %v221_v0, %v220_v1 }
  0x13   : > { %v230_v4 = vadd.f32 %v325_v2, %v222_v3 }
  0x15   : > { %v234_v5 = vsel %vm233_vm0, %v230_v4, 0.0 }
  0x16   : > { %235 = vadd.xlane.f32.xlu0 %v234_v5 }
  0xa3   : > { %v236_v6 = vpop.xlane.xlu0 %235 }
  0xa4   : > { %v238_v7 = vmul.f32 0.03125, %v236_v6 }
  0xa6   : > { %v239_v8 = vsub.f32 %v230_v4, %v238_v7 }
  0xa8   : > { %v240_v9 = vmul.f32 %v239_v8, %v239_v8 }
  0xaa   : > { %v241_v10 = vsel %vm233_vm0, %v240_v9, 0.0 }
  0xab   : > { %242 = vadd.xlane.f32.xlu0 %v241_v10 }
 0x138   : > { %v243_v11 = vpop.xlane.xlu0 %242 }
 0x139   : > { %v244_v12 = vmul.f32 0.03125, %v243_v11 }
 0x13b   : > { %v245_v13 = vadd.f32 1e-12, %v244_v12 }
 0x13d   : > { %338 = vrsqrt.f32 %v245_v13 }
 0x147   : > { %v339_v14 = vpop.eup %338 }
 0x148   : > { %v247_v16 = vmul.f32 %v339_v14, %v239_v8 }
 0x14a   : > { %v254_v18 = vmul.f32 %v326_v15, %v247_v16 }
 0x14c   : > { %v261_v19 = vadd.f32 %v327_v17, %v254_v18 }
 0x14e   : > { %v262_v20 = vpack.c.bf16 %v261_v19, %v261_v19 }
 0x150   : > { %264 = vst.msk [vmem:[%s219_s10] sm:$0xf] %vm263_vm1, %v262_v20 }
 0x151 PF: > { %s15_s18 = sadd.s32 1, %s346_s18  }
 0x152   : > { %p12_p4 = scmp.ge.s32.totalorder %s15_s18, 4  }
 0x154   :  { %14 = sbr.rel (!%p12_p4) target bundleno = 1 (0x1), region = 70 }

// kernel: bert_forward.6
= control target key start
LH: loop header
LB: loop body
LE: loop exit
PB: predicated region body
PF: predicated region fallthrough
CT: control target
= control target key end

     0   :  { %s1180_s24 = smov 0   ;;  %s1307_s0 = inlined_call_operand.vmem [shape: bf16[2,8,32], index: 0, kind: input, shape index: {}]   ;;  %s1308_s1 = inlined_call_operand.vmem [shape: bf16[32,96], index: 1, kind: input, shape index: {}]   ;;  %s1309_s2 = inlined_call_operand.vmem [shape: f32[1,96], index: 2, kind: input, shape index: {}]   ;;  %s1310_s3 = inlined_call_operand.vmem [shape: bf16[32,32], index: 3, kind: input, shape index: {}]   ;;  %s1311_s4 = inlined_call_operand.vmem [shape: f32[1,32], index: 4, kind: input, shape index: {}]   ;;  %s1312_s5 = inlined_call_operand.vmem [shape: f32[1,32], index: 5, kind: input, shape index: {}]   ;;  %s1313_s6 = inlined_call_operand.vmem [shape: f32[1,32], index: 6, kind: input, shape index: {}]   ;;  %s1314_s7 = inlined_call_operand.vmem [shape: bf16[2,8,32], index: 7, kind: output, shape index: {}]  }
   0x1 LB: > { %s957_s25 = sadd.s32 4294967295, %s1122_s24   ;;  %p961_p0 = scmp.ge.s32.totalorder %s1122_s24, 1  ;;  %s1122_s24 = sphi %s1180_s24, %s17_s24  }
   0x2   : > { %p236_p1 = scmp.lt.s32.totalorder %s1122_s24, 3 }
   0x4   : > { %p237_p2 = pnand %p961_p0, %p236_p1 }
   0x5   : > { %v1094_v0 = vld [vmem:[%s1308_s1] sm:$0xff] (!%p237_p2)   ;;  %v1124_v1 = vmov (!%p237_p2), 0.0   ;;  %v1095_v2 = vld [vmem:[%s1308_s1 + $0x8] sm:$0xff] (!%p237_p2)   ;;  %vm1125_vm0 = vmmov (!%p237_p2), 0   ;;  %p266_p3 = scmp.lt.s32.totalorder (!%p237_p2), %s957_s25, 1  ;;  %vm299_vm1 = vcmask (!%p237_p2), 261120  }
   0x6   : > { %240 = sbr.rel (%p237_p2) target bundleno = 1808 (0x710), region = 48  ;;  %1006 = vmatprep.subr.bf16.mxu0 (!%p237_p2), %v1124_v1  ;;  %1014 = vmatprep.subr.bf16.mxu1 (!%p237_p2), %v1124_v1  ;;  %v964_v4 = vld [vmem:[%s1309_s2] ss:$0 sm:$0xff] (!%p237_p2)  ;;  %s1126_s13 = smov (!%p237_p2), 120   ;;  %vm347_vm2 = vcmask (!%p237_p2), 64512   ;;  %vm411_vm3 = vcmask (!%p237_p2), 1043456  }
   0x7   : > { %1007 = vmatpush3.bf16.msra.mxu0 (!%p237_p2), %v1094_v0  ;;  %1010 = vmatprep.mubr.msk.bf16.mxu0 (!%p237_p2), %vm1125_vm0, %v1124_v1  ;;  %s1127_s14 = smov (!%p237_p2), 96   ;;  %s1128_s15 = smov (!%p237_p2), 80   ;;  %vm798_vm4 = vcmask (!%p237_p2), 130048   ;;  %vm800_vm5 = vcmask (!%p237_p2), 195584   ;;  %vm902_vm6 = vcmask (!%p237_p2), 257024  }
   0x8   : > { %1008 = vmatprep.subr.bf16.mxu0 (!%p237_p2), %v1124_v1  ;;  %1016 = vmatprep.mubr.msk.bf16.mxu1 (!%p237_p2), %vm1125_vm0, %v1124_v1  ;;  %s1129_s16 = smov (!%p237_p2), 88   ;;  %s1130_s17 = smov (!%p237_p2), 72  }
   0x9   : > { %s1131_s18 = smov (!%p237_p2), 112   ;;  %s1132_s19 = smov (!%p237_p2), 104  }
   0xa   : > { %s1133_s20 = smov (!%p237_p2), 56   ;;  %s1134_s21 = smov (!%p237_p2), 64  }
   0xb   : > { %1009 = vmatpush3.bf16.msra.mxu0 (!%p237_p2), %v1095_v2  ;;  %s1135_s22 = smov (!%p237_p2), 40   ;;  %s1136_s23 = smov (!%p237_p2), 48  }
   0xc   : > { %1020 = vmatprep.subr.bf16.mxu0 (!%p237_p2), %v1124_v1  ;;  %s1137_s26 = smov (!%p237_p2), 8   ;;  %s1138_s9 = smov (!%p237_p2), 16  }
   0xd   : > { %s1316_s25 = smov (!%p266_p3, %s957_s25), 1 }
   0xe   : > { %s962_s30 = sshll.u32 %s1316_s25, 2 }
   0xf   : > { %s269_s10 = scalar_lea.vmem %s1307_s0, %s962_s30 }
  0x10   : > { %v1210_v3 = vld [vmem:[%s269_s10] sm:$0xf]  ;;  %s1139_s10 = smov 24  }
  0x11   : > { %1011 = vmatmul.mubr.msk.bf16.vlgmr.msra.gmra.mrb[0].mxu0 %vm299_vm1, %v1210_v3 }
  0x12   : > { %1022 = vmatprep.mubr.msk.bf16.mxu0 %vm1125_vm0, %v1124_v1 }
  0xe4   : > { %v337_v5 = vpop.f32.mrb[0].mxu0 }
  0xe5   : > { %v338_v6 = vadd.f32 %v964_v4, %v337_v5  ;;  %v1012_v7 = vpop.f32.mrb[1].mxu0 }
  0xe6   : > { %v340_v8 = vpop.f32.mrb[2].mxu0 }
  0xe7   : > { %v1219_v9 = vpack.c.bf16 %v338_v6, %v338_v6  ;;  %v1013_v10 = vpop.f32.mrb[3].mxu0 }
  0xe9   : > { %455 = vrot.lane.b32.xlu1 %v1219_v9, %s1126_s13  ;;  %345 = vrot.lane.b32.xlu0 %v1219_v9, %s1127_s14 }
  0xed   : > { %567 = vrot.lane.b32.xlu1 %v1219_v9, %s1128_s15  ;;  %457 = vrot.lane.b32.xlu0 %v1219_v9, %s1129_s16 }
  0xf1   : > { %677 = vrot.lane.b32.xlu1 %v1219_v9, %s1130_s17  ;;  %565 = vrot.lane.b32.xlu0 %v1219_v9, %s1131_s18 }
  0xf5   : > { %675 = vrot.lane.b32.xlu0 %v1219_v9, %s1132_s19  ;;  %s273_s19 = scalar_lea.vmem %s1314_s7, %s962_s30 }
 0x15b   : > { %v346_v11 = vpop.permute.xlu0 %345  ;;  %v456_v14 = vpop.permute.xlu1 %455 }
 0x15c   : > { %v352_v12 = vsel %vm347_vm2, %v346_v11, 0 }
 0x15d   : > { %1015 = vmatpush3.bf16.xpose.msra.mxu1 %v352_v12 }
 0x15e   : > { %1026 = vmatprep.subr.bf16.mxu1 %v1124_v1 }
 0x15f   : > { %v458_v13 = vpop.permute.xlu0 %457  ;;  %v568_v16 = vpop.permute.xlu1 %567 }
 0x160   : > { %v463_v15 = vsel %vm347_vm2, %v458_v13, 0  ;;  %v573_v17 = vsel %vm347_vm2, %v568_v16, 0 }
 0x163   : > { %v678_v18 = vpop.permute.xlu1 %677  ;;  %v566_v19 = vpop.permute.xlu0 %565 }
 0x164   : > { %1017 = vmatmul.mubr.msk.bf16.vlgmr.msra.gmra.mrb[0].mxu1 %vm347_vm2, %v1219_v9  ;;  %v683_v20 = vsel %vm347_vm2, %v678_v18, 0 }
 0x165   : > { %1027 = vmatpush3.bf16.xpose.msra.mxu1 %v463_v15  ;;  %1028 = vmatprep.mubr.msk.bf16.mxu1 %vm1125_vm0, %v1124_v1 }
 0x166   : > { %1038 = vmatprep.subr.bf16.mxu1 %v1124_v1 }
 0x167   : > { %v676_v21 = vpop.permute.xlu0 %675 }
 0x16c   : > { %1029 = vmatmul.mubr.msk.bf16.vlgmr.msra.gmra.mrb[4].mxu1 %vm347_vm2, %v456_v14 }
 0x16d   : > { %1039 = vmatpush3.bf16.xpose.msra.mxu1 %v573_v17  ;;  %1040 = vmatprep.mubr.msk.bf16.mxu1 %vm1125_vm0, %v1124_v1 }
 0x16e   : > { %1050 = vmatprep.subr.bf16.mxu1 %v1124_v1 }
 0x174   : > { %1041 = vmatmul.mubr.msk.bf16.vlgmr.msra.gmra.mrb[8].mxu1 %vm347_vm2, %v566_v19 }
 0x175   : > { %1051 = vmatpush3.bf16.xpose.msra.mxu1 %v683_v20  ;;  %1052 = vmatprep.mubr.msk.bf16.mxu1 %vm1125_vm0, %v1124_v1 }
 0x176   : > { %1062 = vmatprep.subr.bf16.mxu1 %v1124_v1 }
 0x17c   : > { %1053 = vmatmul.mubr.msk.bf16.vlgmr.msra.gmra.mrb[12].mxu1 %vm347_vm2, %v676_v21 }
 0x17d   : > { %1066 = vmatprep.mubr.msk.bf16.mxu1 %vm1125_vm0, %v1124_v1 }
 0x237   : > { %v388_v22 = vpop.f32.mrb[0].mxu1 }
 0x238   : > { %v1018_v23 = vpop.f32.mrb[1].mxu1  ;;  %v394_v24 = vsel %vm347_vm2, %v388_v22, -inf }
 0x239   : > { %395 = vmax.xlane.f32.xlu1 %v394_v24  ;;  %v391_v25 = vpop.f32.mrb[2].mxu1 }
 0x23a   : > { %v1019_v26 = vpop.f32.mrb[3].mxu1 }
 0x23f   : > { %v499_v27 = vpop.f32.mrb[4].mxu1 }
 0x240   : > { %v1030_v28 = vpop.f32.mrb[5].mxu1  ;;  %v505_v29 = vsel %vm347_vm2, %v499_v27, -inf }
 0x241   : > { %506 = vmax.xlane.f32.xlu0 %v505_v29  ;;  %v502_v30 = vpop.f32.mrb[6].mxu1 }
 0x242   : > { %v1031_v31 = vpop.f32.mrb[7].mxu1 }
 0x247   : > { %v609_v32 = vpop.f32.mrb[8].mxu1 }
 0x248   : > { %v1042_v33 = vpop.f32.mrb[9].mxu1  ;;  %v615_v34 = vsel %vm347_vm2, %v609_v32, -inf }
 0x249   : > { %616 = vmax.xlane.f32.xlu0 %v615_v34  ;;  %v612_v35 = vpop.f32.mrb[10].mxu1  ;;  %v1097_v33 = vld [vmem:[%s1310_s3 + $0x8] sm:$0xff]  }
 0x24a   : > { %v1043_v36 = vpop.f32.mrb[11].mxu1 }
 0x24f   : > { %v719_v37 = vpop.f32.mrb[12].mxu1 }
 0x250   : > { %v1054_v38 = vpop.f32.mrb[13].mxu1  ;;  %v725_v39 = vsel %vm347_vm2, %v719_v37, -inf }
 0x251   : > { %726 = vmax.xlane.f32.xlu1 %v725_v39  ;;  %v722_v40 = vpop.f32.mrb[14].mxu1 }
 0x252   : > { %v1055_v41 = vpop.f32.mrb[15].mxu1 }
 0x2c6   : > { %v396_v42 = vpop.xlane.xlu1 %395 }
 0x2c7   : > { %v397_v43 = vsub.f32 %v388_v22, %v396_v42 }
 0x2c9   : > { %v398_v44 = vmul.f32 1.442695, %v397_v43 }
 0x2cb   : > { %1098 = vpow2.f32 %v398_v44 }
 0x2ce   : > { %v507_v45 = vpop.xlane.xlu0 %506 }
 0x2cf   : > { %v508_v46 = vsub.f32 %v499_v27, %v507_v45 }
 0x2d1   : > { %v509_v47 = vmul.f32 1.442695, %v508_v46 }
 0x2d3   : > { %1100 = vpow2.f32 %v509_v47 }
 0x2d5   : > { %v1099_v48 = vpop.eup %1098 }
 0x2d6   : > { %v617_v49 = vpop.xlane.xlu0 %616  ;;  %v400_v50 = vsel %vm347_vm2, %v1099_v48, 0.0 }
 0x2d7   : > { %v618_v51 = vsub.f32 %v609_v32, %v617_v49  ;;  %401 = vadd.xlane.f32.xlu0 %v400_v50  ;;  %v1096_v32 = vld [vmem:[%s1310_s3] sm:$0xff]   ;;  %v869_v49 = vunpack.c.l.bf16 %v1210_v3 }
 0x2d8   : > { %1063 = vmatpush3.bf16.msra.mxu1 %v1096_v32 }
 0x2d9   : > { %v619_v52 = vmul.f32 1.442695, %v618_v51  ;;  %1064 = vmatprep.subr.bf16.mxu1 %v1124_v1 }
 0x2db   : > { %1102 = vpow2.f32 %v619_v52 }
 0x2dc   : > { %1065 = vmatpush3.bf16.msra.mxu1 %v1097_v33 }
 0x2dd   : > { %v1101_v53 = vpop.eup %1100 }
 0x2de   : > { %v511_v54 = vsel %vm347_vm2, %v1101_v53, 0.0  ;;  %v727_v57 = vpop.xlane.xlu1 %726 }
 0x2df   : > { %512 = vadd.xlane.f32.xlu1 %v511_v54  ;;  %v728_v58 = vsub.f32 %v719_v37, %v727_v57 }
 0x2e1   : > { %v729_v59 = vmul.f32 1.442695, %v728_v58 }
 0x2e3   : > { %1104 = vpow2.f32 %v729_v59 }
 0x2e5   : > { %v1103_v55 = vpop.eup %1102 }
 0x2e6   : > { %v621_v56 = vsel %vm347_vm2, %v1103_v55, 0.0 }
 0x2e7   : > { %622 = vadd.xlane.f32.xlu0 %v621_v56 }
 0x2ed   : > { %v1105_v60 = vpop.eup %1104 }
 0x2ee   : > { %v731_v61 = vsel %vm347_vm2, %v1105_v60, 0.0 }
 0x2f0   : > { %517 = vrot.lane.b32.xlu1 %v1219_v9, %s1133_s20 }
 0x2fd   : > { %406 = vrot.lane.b32.xlu0 %v1219_v9, %s1134_s21 }
 0x301   : > { %737 = vrot.lane.b32.xlu0 %v1219_v9, %s1135_s22 }
 0x314   : > { %732 = vadd.xlane.f32.xlu1 %v731_v61 }
 0x325   : > { %627 = vrot.lane.b32.xlu1 %v1219_v9, %s1136_s23 }
 0x364   : > { %v402_v62 = vpop.xlane.xlu0 %401 }
 0x365   : > { %1106 = vrcp.f32 %v402_v62 }
 0x36c   : > { %v513_v63 = vpop.xlane.xlu1 %512 }
 0x36d   : > { %1108 = vrcp.f32 %v513_v63 }
 0x36f   : > { %v1107_v0 = vpop.eup %1106 }
 0x370   : > { %v404_v4 = vmul.f32 %v1107_v0, %v1099_v48  ;;  %v518_v7 = vpop.permute.xlu1 %517  ;;  %v976_v48 = vld [vmem:[%s1311_s4] ss:$0 sm:$0xff] }
 0x371   : > { %v523_v11 = vsel %vm411_vm3, %v518_v7, 0 }
 0x372   : > { %v405_v8 = vpack.c.bf16 %v404_v4, %v404_v4 }
 0x374   : > { %v623_v2 = vpop.xlane.xlu0 %622 }
 0x375   : > { %1110 = vrcp.f32 %v623_v2  ;;  %v980_v2 = vld [vmem:[%s1312_s5] ss:$0 sm:$0xff] }
 0x377   : > { %v1109_v10 = vpop.eup %1108 }
 0x378   : > { %v407_v5 = vpop.permute.xlu0 %406  ;;  %v515_v9 = vmul.f32 %v1109_v10, %v1101_v53 }
 0x379   : > { %v413_v6 = vsel %vm411_vm3, %v407_v5, 0  ;;  %v981_v5 = vld [vmem:[%s1313_s6] ss:$0 sm:$0xff] }
 0x37a   : > { %1021 = vmatpush3.bf16.msra.mxu0 %v413_v6  ;;  %v516_v12 = vpack.c.bf16 %v515_v9, %v515_v9 }
 0x37b   : > { %1032 = vmatprep.subr.bf16.mxu0 %v1124_v1 }
 0x37c   : > { %v738_v18 = vpop.permute.xlu0 %737 }
 0x37d   : > { %1023 = vmatmul.mubr.msk.bf16.vlgmr.msra.gmra.mrb[4].mxu0 %vm347_vm2, %v405_v8  ;;  %v743_v20 = vsel %vm411_vm3, %v738_v18, 0 }
 0x37e   : > { %1033 = vmatpush3.bf16.msra.mxu0 %v523_v11  ;;  %1034 = vmatprep.mubr.msk.bf16.mxu0 %vm1125_vm0, %v1124_v1 }
 0x37f   : > { %1044 = vmatprep.subr.bf16.mxu0 %v1124_v1  ;;  %v1111_v13 = vpop.eup %1110 }
 0x380   : > { %v625_v15 = vmul.f32 %v1111_v13, %v1103_v55 }
 0x382   : > { %v626_v19 = vpack.c.bf16 %v625_v15, %v625_v15 }
 0x385   : > { %1035 = vmatmul.mubr.msk.bf16.vlgmr.msra.gmra.mrb[8].mxu0 %vm347_vm2, %v516_v12 }
 0x386   : > { %1046 = vmatprep.mubr.msk.bf16.mxu0 %vm1125_vm0, %v1124_v1 }
 0x3a1   : > { %v733_v14 = vpop.xlane.xlu1 %732 }
 0x3a2   : > { %1112 = vrcp.f32 %v733_v14 }
 0x3a5   : > { %v628_v16 = vpop.permute.xlu1 %627 }
 0x3a6   : > { %v633_v17 = vsel %vm411_vm3, %v628_v16, 0 }
 0x3a7   : > { %1045 = vmatpush3.bf16.msra.mxu0 %v633_v17 }
 0x3a8   : > { %1056 = vmatprep.subr.bf16.mxu0 %v1124_v1 }
 0x3aa   : > { %1047 = vmatmul.mubr.msk.bf16.vlgmr.msra.gmra.mrb[12].mxu0 %vm347_vm2, %v626_v19 }
 0x3ab   : > { %1057 = vmatpush3.bf16.msra.mxu0 %v743_v20  ;;  %1058 = vmatprep.mubr.msk.bf16.mxu0 %vm1125_vm0, %v1124_v1 }
 0x3ac   : > { %v1113_v21 = vpop.eup %1112 }
 0x3ad   : > { %v735_v22 = vmul.f32 %v1113_v21, %v1105_v60 }
 0x3af   : > { %v736_v23 = vpack.c.bf16 %v735_v22, %v735_v22 }
 0x3b2   : > { %1059 = vmatmul.mubr.msk.bf16.vlgmr.msra.gmra.mrb[16].mxu0 %vm347_vm2, %v736_v23 }
 0x450   : > { %v449_v24 = vpop.f32.mrb[4].mxu0 }
 0x451   : > { %v1024_v25 = vpop.f32.mrb[5].mxu0 }
 0x452   : > { %v452_v26 = vpop.f32.mrb[6].mxu0 }
 0x453   : > { %v1025_v27 = vpop.f32.mrb[7].mxu0 }
 0x458   : > { %v559_v28 = vpop.f32.mrb[8].mxu0 }
 0x459   : > { %786 = vrot.lane.b32.xlu1 %v559_v28, %s1137_s26  ;;  %v1036_v29 = vpop.f32.mrb[9].mxu0 }
 0x45a   : > { %v562_v30 = vpop.f32.mrb[10].mxu0 }
 0x45b   : > { %v1037_v31 = vpop.f32.mrb[11].mxu0 }
 0x47d   : > { %v669_v34 = vpop.f32.mrb[12].mxu0 }
 0x47e   : > { %790 = vrot.lane.b32.xlu0 %v669_v34, %s1138_s9  ;;  %v1048_v35 = vpop.f32.mrb[13].mxu0 }
 0x47f   : > { %v672_v36 = vpop.f32.mrb[14].mxu0 }
 0x480   : > { %v1049_v37 = vpop.f32.mrb[15].mxu0 }
 0x485   : > { %v779_v38 = vpop.f32.mrb[16].mxu0 }
 0x486   : > { %794 = vrot.lane.b32.xlu1 %v779_v38, %s1139_s10  ;;  %v1060_v39 = vpop.f32.mrb[17].mxu0 }
 0x487   : > { %v782_v40 = vpop.f32.mrb[18].mxu0 }
 0x488   : > { %v1061_v41 = vpop.f32.mrb[19].mxu0 }
 0x4cb   : > { %v787_v42 = vpop.permute.xlu1 %786 }
 0x4cc   : > { %v797_v43 = vsel %vm347_vm2, %v449_v24, %v787_v42 }
 0x4f0   : > { %v791_v1 = vpop.permute.xlu0 %790 }
 0x4f1   : > { %v799_v44 = vsel %vm798_vm4, %v797_v43, %v791_v1 }
 0x4f8   : > { %v795_v45 = vpop.permute.xlu1 %794 }
 0x4f9   : > { %v801_v46 = vsel %vm800_vm5, %v799_v44, %v795_v45 }
 0x4fa   : > { %v802_v47 = vpack.c.bf16 %v801_v46, %v801_v46 }
 0x4fc   : > { %1067 = vmatmul.mubr.msk.bf16.vlgmr.msra.gmra.mrb[16].mxu1 %vm299_vm1, %v802_v47 }
 0x5cf   : > { %v863_v50 = vpop.f32.mrb[16].mxu1 }
 0x5d0   : > { %v864_v51 = vadd.f32 %v976_v48, %v863_v50  ;;  %v1068_v52 = vpop.f32.mrb[17].mxu1 }
 0x5d1   : > { %v866_v53 = vpop.f32.mrb[18].mxu1 }
 0x5d2   : > { %v1069_v54 = vpop.f32.mrb[19].mxu1  ;;  %v870_v55 = vadd.f32 %v869_v49, %v864_v51 }
 0x5d4   : > { %v873_v56 = vsel %vm299_vm1, %v870_v55, 0.0 }
 0x5d5   : > { %874 = vadd.xlane.f32.xlu0 %v873_v56 }
 0x662   : > { %v875_v57 = vpop.xlane.xlu0 %874 }
 0x663   : > { %v877_v58 = vmul.f32 0.03125, %v875_v57 }
 0x665   : > { %v878_v59 = vsub.f32 %v870_v55, %v877_v58 }
 0x667   : > { %v879_v60 = vmul.f32 %v878_v59, %v878_v59 }
 0x669   : > { %v880_v61 = vsel %vm299_vm1, %v879_v60, 0.0 }
 0x66a   : > { %881 = vadd.xlane.f32.xlu1 %v880_v61 }
 0x6f7   : > { %v882_v62 = vpop.xlane.xlu1 %881 }
 0x6f8   : > { %v883_v63 = vmul.f32 0.03125, %v882_v62 }
 0x6fa   : > { %v884_v3 = vadd.f32 1e-12, %v883_v63 }
 0x6fc   : > { %1114 = vrsqrt.f32 %v884_v3 }
 0x706   : > { %v1115_v0 = vpop.eup %1114 }
 0x707   : > { %v886_v4 = vmul.f32 %v1115_v0, %v878_v59 }
 0x709   : > { %v893_v6 = vmul.f32 %v980_v2, %v886_v4 }
 0x70b   : > { %v900_v7 = vadd.f32 %v981_v5, %v893_v6 }
 0x70d   : > { %v901_v8 = vpack.c.bf16 %v900_v7, %v900_v7 }
 0x70f   : > { %903 = vst.msk [vmem:[%s273_s19] sm:$0xf] %vm902_vm6, %v901_v8 }
 0x710 PF: > { %s17_s24 = sadd.s32 1, %s1122_s24  }
 0x711   : > { %p14_p4 = scmp.ge.s32.totalorder %s17_s24, 4  }
 0x713   :  { %16 = sbr.rel (!%p14_p4) target bundleno = 1 (0x1), region = 78 }

</bundles_post_ra>
